<compile_context>
chip_gen: v7x
topology: tpu7x:2x2x1
jax: 0.10.0
libtpu: 0.0.40
codegen_flags: <defaults>
</compile_context>

<pallas_src>
import jax
import jax.numpy as jnp
import numpy as np
from jax import lax
from jax.experimental import pallas as pl
from jax.experimental.pallas import tpu as pltpu


def _round_up(x, m):
    return ((x + m - 1) // m) * m


# ----------------------------- Pallas kernel --------------------------------
def _proj_matmul_kernel(patches_ref, weight_ref, bias_ref, out_ref):
    # patches_ref: [TM, K] bf16, weight_ref: [K, TN] bf16,
    # bias_ref:    [1, TN] f32,  out_ref:    [TM, TN] f32
    acc = jnp.dot(patches_ref[...], weight_ref[...],
                  preferred_element_type=jnp.float32)
    out_ref[...] = acc + bias_ref[...]


def _proj_matmul(patches, weight, bias, *, tm=512, tn=256):
    """[M, K] @ [K, N] + [1, N] -> [M, N] f32.  Tiled over (M, N); K un-tiled.

    patches/weight are expected in bf16, bias in f32.  Tiles are sized so that
    for ViT-B shapes (K = N = 768, TM = 512, TN = 256) the double-buffered
    working set is ~3.3 MiB — well inside the default scoped VMEM limit on all
    of v5e / v6e / v7x.
    """
    M, K = patches.shape
    K2, N = weight.shape
    assert K == K2, (K, K2)

    # Respect the (8, 128) layout constraint; shrink tiles for tiny shapes.
    TM = min(tm, _round_up(M, 8))
    TN = min(tn, _round_up(N, 128))
    Mp = _round_up(M, TM)
    Np = _round_up(N, TN)

    if Mp != M:
        patches = jnp.pad(patches, ((0, Mp - M), (0, 0)))
    if Np != N:
        weight = jnp.pad(weight, ((0, 0), (0, Np - N)))
        bias = jnp.pad(bias, ((0, 0), (0, Np - N)))

    grid = (Mp // TM, Np // TN)

    cost = pl.CostEstimate(
        flops=2 * Mp * K * Np,
        transcendentals=0,
        bytes_accessed=(Mp * K * patches.dtype.itemsize
                        + K * Np * weight.dtype.itemsize
                        + Np * bias.dtype.itemsize
                        + Mp * Np * 4),
    )

    out = pl.pallas_call(
        _proj_matmul_kernel,
        out_shape=jax.ShapeDtypeStruct((Mp, Np), jnp.float32),
        grid_spec=pl.GridSpec(
            grid=grid,
            in_specs=[
                pl.BlockSpec((TM, K), lambda i, j: (i, 0)),   # patch rows
                pl.BlockSpec((K, TN), lambda i, j: (0, j)),   # weight cols
                pl.BlockSpec((1, TN), lambda i, j: (0, j)),   # bias (N only)
            ],
            out_specs=pl.BlockSpec((TM, TN), lambda i, j: (i, j)),
        ),
        compiler_params=pltpu.CompilerParams(
            dimension_semantics=("parallel", "parallel"),
        ),
        cost_estimate=cost,
    )(patches, weight, bias)

    if (Mp, Np) != (M, N):
        out = out[:M, :N]
    return out


# ------------------------------ PatchEmbed -----------------------------------
class PatchEmbed:
    """Image to Patch Embedding (JAX / Pallas).

    Matches the PyTorch module:
      proj = Conv2d(in_chans, embed_dim, kernel_size=patch_size,
                    stride=patch_size // ratio,
                    padding=4 + 2 * (ratio // 2 - 1))
      forward: x -> proj(x) -> flatten(2).transpose(1, 2), return (x, (Hp, Wp))
    """

    def __init__(self, img_size=224, patch_size=16, in_chans=3, embed_dim=768,
                 ratio=1, key=None):
        img_size = (img_size, img_size) if isinstance(img_size, int) else img_size
        patch_size = (patch_size, patch_size) if isinstance(patch_size, int) else patch_size
        self.img_size = img_size
        self.patch_size = patch_size
        self.stride = patch_size[0] // ratio
        self.padding = 4 + 2 * (ratio // 2 - 1)
        self.patch_shape = (int(img_size[0] // patch_size[0] * ratio),
                            int(img_size[1] // patch_size[1] * ratio))
        self.num_patches = (img_size[1] // patch_size[1]) * (img_size[0] // patch_size[0]) * ratio ** 2
        self.in_chans = in_chans
        self.embed_dim = embed_dim

        if key is None:
            key = jax.random.PRNGKey(0)
        k_w, k_b = jax.random.split(key)
        fan_in = in_chans * patch_size[0] * patch_size[1]
        bound = 1.0 / np.sqrt(fan_in)
        # Conv2d weight layout: [embed_dim, in_chans, KH, KW] (PyTorch OIHW).
        self.weight = jax.random.uniform(
            k_w, (embed_dim, in_chans, patch_size[0], patch_size[1]),
            dtype=jnp.float32, minval=-bound, maxval=bound)
        self.bias = jax.random.uniform(
            k_b, (embed_dim,), dtype=jnp.float32, minval=-bound, maxval=bound)

        # Hoisted out of the forward path: matmul-layout weight [C*KH*KW, E]
        # in bf16 (MXU-native), bias as [1, E] f32 for the in-kernel add.
        self.w_mat = jnp.transpose(self.weight, (1, 2, 3, 0)).reshape(
            fan_in, embed_dim).astype(jnp.bfloat16)
        self.b_mat = self.bias.reshape(1, embed_dim).astype(jnp.float32)

    def _im2col(self, x):
        """NCHW image -> [B*Hp*Wp, C*KH*KW] bf16 patch matrix."""
        B, C, H, W = x.shape
        KH, KW = self.patch_size
        s, p = self.stride, self.padding
        Hp = (H + 2 * p - KH) // s + 1
        Wp = (W + 2 * p - KW) // s + 1

        x = x.astype(jnp.bfloat16)  # halve HBM traffic of the patch matrix
        x_pad = jnp.pad(x, ((0, 0), (0, 0), (p, p), (p, p)))

        if s == KH and s == KW:
            # ratio == 1: non-overlapping patches -> crop + reshape + transpose.
            x_pad = x_pad[:, :, :Hp * KH, :Wp * KW]
            x_pad = x_pad.reshape(B, C, Hp, KH, Wp, KW)
            patches = jnp.transpose(x_pad, (0, 2, 4, 1, 3, 5))
            patches = patches.reshape(B * Hp * Wp, C * KH * KW)
        else:
            # ratio > 1: overlapping patches (strided-slice gather in bf16).
            # TODO(synk): move this gather into the kernel (index_map per
            # (kh, kw) or manual DMA) to avoid materializing the duplicated
            # patch matrix in HBM.
            cols = []
            for kh in range(KH):
                for kw in range(KW):
                    sl = lax.slice(
                        x_pad,
                        (0, 0, kh, kw),
                        (B, C, kh + s * (Hp - 1) + 1, kw + s * (Wp - 1) + 1),
                        (1, 1, s, s),
                    )
                    cols.append(sl)                      # [B, C, Hp, Wp] each
            patches = jnp.stack(cols, axis=0)            # [KH*KW, B, C, Hp, Wp]
            patches = jnp.transpose(patches, (1, 3, 4, 2, 0))  # [B,Hp,Wp,C,KH*KW]
            patches = patches.reshape(B * Hp * Wp, C * KH * KW)

        return patches, Hp, Wp

    def __call__(self, x):
        # x: [B, C, H, W]  (NCHW, same as PyTorch)
        B = x.shape[0]
        patches, Hp, Wp = self._im2col(x)

        # Hot path: tiled Pallas matmul + bias (bf16 in, f32 accumulate/out).
        out = _proj_matmul(patches, self.w_mat, self.b_mat)   # [B*Hp*Wp, E]

        out = out.reshape(B, Hp * Wp, self.embed_dim)
        return out, (Hp, Wp)


# ------------------------------ reference ------------------------------------
def _reference_forward(module, x):
    """Pure-JAX f32 reference: lax.conv + flatten/transpose (for validation)."""
    p = module.padding
    y = lax.conv_general_dilated(
        x, module.weight,
        window_strides=(module.stride, module.stride),
        padding=((p, p), (p, p)),
        dimension_numbers=("NCHW", "OIHW", "NCHW"),
    ) + module.bias.reshape(1, -1, 1, 1)
    B, E, Hp, Wp = y.shape
    y = y.reshape(B, E, Hp * Wp).transpose(0, 2, 1)
    return y, (Hp, Wp)


if __name__ == "__main__":
    key = jax.random.PRNGKey(0)
    k_in, k_param = jax.random.split(key)

    # Small shapes consistent with the module's forward:
    # img_size=16, patch_size=4, in_chans=4, embed_dim=32, ratio=1
    #   -> stride=4, padding=2, Hp=Wp=5
    B, C, H, W = 2, 4, 16, 16
    x = jax.random.normal(k_in, (B, C, H, W), dtype=jnp.float32)

    module = PatchEmbed(img_size=16, patch_size=4, in_chans=C, embed_dim=32,
                        ratio=1, key=k_param)

    out, (Hp, Wp) = module(x)
    out = jax.block_until_ready(out)

    ref, (Hp_r, Wp_r) = _reference_forward(module, x)
    ref = jax.block_until_ready(ref)

    assert out.shape == (B, Hp * Wp, 32), out.shape
    assert (Hp, Wp) == (Hp_r, Wp_r)
    # bf16 inputs with f32 accumulation: loosen tolerance vs the f32 reference.
    np.testing.assert_allclose(np.asarray(out), np.asarray(ref),
                               rtol=2e-2, atol=2e-2)

    print("KERNEL_OK")
</pallas_src>

<mosaic_0001>
module attributes {stable_mosaic.version = 11 : i64} {
  func.func @_proj_matmul_kernel(%arg0: i32, %arg1: i32, %arg2: memref<56x64xbf16, #tpu.memory_space<vmem>>, %arg3: memref<64x128xbf16, #tpu.memory_space<vmem>>, %arg4: memref<1x128xf32, #tpu.memory_space<vmem>>, %arg5: memref<56x128xf32, #tpu.memory_space<vmem>>) attributes {dimension_semantics = [#tpu.dimension_semantics<parallel>, #tpu.dimension_semantics<parallel>], iteration_bounds = array<i64: 1, 1>, scalar_prefetch = 0 : i64, scratch_operands = 0 : i64, tpu.core_type = #tpu.core_type<tc>, window_params = [{transform_indices = @transform_0, window_bounds = array<i64: 56, 64>}, {transform_indices = @transform_1, window_bounds = array<i64: 64, 128>}, {transform_indices = @transform_2, window_bounds = array<i64: 1, 128>}, {transform_indices = @transform_3, window_bounds = array<i64: 56, 128>}]} {
    %c0 = arith.constant 0 : index
    %c0_0 = arith.constant 0 : index
    %0 = vector.load %arg2[%c0, %c0_0] : memref<56x64xbf16, #tpu.memory_space<vmem>>, vector<56x64xbf16>
    %c0_1 = arith.constant 0 : index
    %c0_2 = arith.constant 0 : index
    %1 = vector.load %arg3[%c0_1, %c0_2] : memref<64x128xbf16, #tpu.memory_space<vmem>>, vector<64x128xbf16>
    %cst = arith.constant dense<0.000000e+00> : vector<56x128xf32>
    %2 = tpu.matmul %0, %1, %cst {dimension_numbers = #tpu.dot_dimension_numbers<[1], [0], [0], [1], [0, 0, 1, 1], [], []>} : vector<56x64xbf16>, vector<64x128xbf16>, vector<56x128xf32> -> vector<56x128xf32>
    %c0_3 = arith.constant 0 : index
    %c0_4 = arith.constant 0 : index
    %3 = vector.load %arg4[%c0_3, %c0_4] : memref<1x128xf32, #tpu.memory_space<vmem>>, vector<1x128xf32>
    %4 = vector.broadcast %3 : vector<1x128xf32> to vector<56x128xf32>
    %5 = arith.addf %2, %4 : vector<56x128xf32>
    %c0_5 = arith.constant 0 : index
    %c0_6 = arith.constant 0 : index
    %6 = vector.load %arg5[%c0_5, %c0_6] : memref<56x128xf32, #tpu.memory_space<vmem>>, vector<56x128xf32>
    tpu.vector_store %arg5[%c0_5, %c0_6], %5 {strides = array<i32>} : memref<56x128xf32, #tpu.memory_space<vmem>>, vector<56x128xf32>,
    return
  }
  func.func @transform_0(%arg0: i32, %arg1: i32) -> (i32, i32) {
    %c0_i32 = arith.constant 0 : i32
    %c0_i32_0 = arith.constant 0 : i32
    return %arg0, %c0_i32 : i32, i32
  }
  func.func @transform_1(%arg0: i32, %arg1: i32) -> (i32, i32) {
    %c0_i32 = arith.constant 0 : i32
    %c0_i32_0 = arith.constant 0 : i32
    return %c0_i32, %arg1 : i32, i32
  }
  func.func @transform_2(%arg0: i32, %arg1: i32) -> (i32, i32) {
    %c0_i32 = arith.constant 0 : i32
    %c0_i32_0 = arith.constant 0 : i32
    return %c0_i32, %arg1 : i32, i32
  }
  func.func @transform_3(%arg0: i32, %arg1: i32) -> (i32, i32) {
    %c0_i32 = arith.constant 0 : i32
    return %arg0, %arg1 : i32, i32
  }
}

</mosaic_0001>

<bundles_post_ra>
// kernel: tpu_custom_call.1
= control target key start
LH: loop header
LB: loop body
LE: loop exit
PB: predicated region body
PF: predicated region fallthrough
CT: control target
= control target key end

     0   :  { %8 = vsyncpa [#allocation3], 0  ;;  %s412_s0 = inlined_call_operand.hbm [shape: bf16[56,64], index: 0, kind: input, shape index: {}]   ;;  %s413_s1 = inlined_call_operand.hbm [shape: bf16[64,128], index: 1, kind: input, shape index: {}]   ;;  %s414_s2 = inlined_call_operand.vmem [shape: f32[1,128], index: 2, kind: input, shape index: {}]   ;;  %s415_s3 = inlined_call_operand.hbm [shape: f32[56,128], index: 3, kind: output, shape index: {}]  }
   0x1   :  { %9 = vsyncpa [#allocation6], 0 }
   0x2   :  { %10 = vsyncpa [#allocation4], 0  ;;  %s342_s12 = smov [#allocation2]   ;;  %s270_s16 = scalar_lea.hbm %s412_s0, 448 }
   0x3   :  { %s16_s13 = sshll.u32 %s342_s12, 4  ;;  %p271_p0 = scmp.ne.s32.totalorder %s412_s0, %s270_s16  ;;  %s17_s13 = int_to_ptr.vmem [resolvable:$true] %s16_s13 }
   0x4   :  { %p274_p1 = scmp.lt.u32.totalorder %s270_s16, %s412_s0 }
   0x6   :  { %p276_p2 = pnand %p274_p1, %p271_p0 }
   0x8   :  { %279 = shalt.err (!%p276_p2)
}
   0x9   :  { %s280_s21 = scalar_lea.vmem %s17_s13, 448  ;;  %p285_p4 = scmp.lt.s32.totalorder %s17_s13, %s17_s13 }
   0xa   :  { %p281_p3 = scmp.ne.s32.totalorder %s17_s13, %s280_s21  ;;  %p286_p5 = scmp.lt.s32.totalorder %s280_s21, %s280_s21 }
   0xc   :  { %p287_p6 = por %p286_p5, %p285_p4 }
   0xe   :  { %p288_p7 = pnand %p287_p6, %p281_p3 }
  0x10   :  { %291 = shalt.err (!%p288_p7)
}
  0x11   :  { %s343_s22 = smov 64   ;;  %s344_s23 = smov 4  }
  0x12   :  { %22 = dma.hbm_to_vmem [thread:$0]  %s412_s0, 448, %s17_s13, [#allocation3], %s343_s22, %s343_s22, %s344_s23  }
  0x13   :  { %s345_s26 = smov [#allocation5]   ;;  %s292_s30 = scalar_lea.hbm %s413_s1, 512 }
  0x14   :  { %s28_s27 = sshll.u32 %s345_s26, 4  ;;  %p293_p8 = scmp.ne.s32.totalorder %s413_s1, %s292_s30  ;;  %s29_s27 = int_to_ptr.vmem [resolvable:$true] %s28_s27 }
  0x15   :  { %p296_p9 = scmp.lt.u32.totalorder %s292_s30, %s413_s1 }
  0x17   :  { %p298_p10 = pnand %p296_p9, %p293_p8 }
  0x19   :  { %301 = shalt.err (!%p298_p10)
}
  0x1a   :  { %s302_s8 = scalar_lea.vmem %s29_s27, 512  ;;  %p307_p12 = scmp.lt.s32.totalorder %s29_s27, %s29_s27 }
  0x1b   :  { %p303_p11 = scmp.ne.s32.totalorder %s29_s27, %s302_s8  ;;  %p308_p13 = scmp.lt.s32.totalorder %s302_s8, %s302_s8 }
  0x1d   :  { %p309_p0 = por %p308_p13, %p307_p12 }
  0x1f   :  { %p310_p1 = pnand %p309_p0, %p303_p11 }
  0x21   :  { %313 = shalt.err (!%p310_p1)
}
  0x22   :  { %34 = dma.hbm_to_vmem [thread:$0]  %s413_s1, 512, %s29_s27, [#allocation6], %s343_s22, %s343_s22, %s344_s23  }
  0x23   :  { %336 = dma.done.wait [#allocation3], 448  }
  0x24   :  { %337 = vsyncadd [#allocation3], 4294966848 }
  0x25   :  { %338 = dma.done.wait [#allocation6], 512  }
  0x26   :  { %339 = vsyncadd [#allocation6], 4294966784  ;;  %v262_v0 = vld [vmem:[#allocation5] sm:$0xff]   ;;  %v263_v1 = vld [vmem:[#allocation5 + $0x8] sm:$0xff]   ;;  %vm108_vm0 = vcmask 523264   ;;  %s346_s11 = smov [#allocation7]  }
  0x27   :  { %231 = vmatprep.subr.bf16.mxu0 %v262_v0  ;;  %247 = vmatprep.subr.bf16.mxu1 %v262_v0  ;;  %v264_v2 = vld [vmem:[#allocation5 + $0x10] sm:$0xff]   ;;  %v266_v3 = vld [vmem:[#allocation2] sm:$0xff]   ;;  %v265_v5 = vld [vmem:[#allocation5 + $0x18] sm:$0xff]   ;;  %s197_s12 = sshll.u32 %s346_s11, 4  ;;  %s198_s12 = int_to_ptr.vmem [resolvable:$true] %s197_s12 }
  0x28   :  { %232 = vmatpush3.bf16.msra.mxu0 %v262_v0  ;;  %251 = vmatpush3.bf16.msra.mxu1 %v262_v0  ;;  %v267_v4 = vld [vmem:[#allocation2 + $0x10] sm:$0xff]   ;;  %v268_v6 = vld [vmem:[#allocation2 + $0x8] sm:$0xff]   ;;  %v269_v7 = vld [vmem:[#allocation2 + $0x18] ss:$0 sps:$4 sm:$0xff]   ;;  %p319_p3 = scmp.lt.s32.totalorder %s198_s12, %s198_s12 }
  0x29   :  { %233 = vmatprep.subr.bf16.mxu0 %v263_v1  ;;  %248 = vmatprep.subr.bf16.mxu1 %v263_v1  ;;  %v210_v8 = vld [vmem:[%s414_s2] ss:$0 sm:$0xff]  ;;  %s314_s2 = scalar_lea.vmem %s198_s12, 896 }
  0x2a   :  { %239 = vmatprep.mubr.msk.bf16.mxu0 %vm108_vm0, %v266_v3  ;;  %243 = vmatprep.mubr.msk.bf16.mxu1 %vm108_vm0, %v267_v4  ;;  %p315_p2 = scmp.ne.s32.totalorder %s198_s12, %s314_s2  ;;  %p320_p4 = scmp.lt.s32.totalorder %s314_s2, %s314_s2 }
  0x2c   :  { %234 = vmatpush3.bf16.msra.mxu0 %v263_v1  ;;  %252 = vmatpush3.bf16.msra.mxu1 %v263_v1  ;;  %p321_p5 = por %p320_p4, %p319_p3 }
  0x2d   :  { %235 = vmatprep.subr.bf16.mxu0 %v264_v2  ;;  %249 = vmatprep.subr.bf16.mxu1 %v264_v2 }
  0x2e   :  { %p322_p6 = pnand %p321_p5, %p315_p2 }
  0x30   :  { %236 = vmatpush3.bf16.msra.mxu0 %v264_v2  ;;  %253 = vmatpush3.bf16.msra.mxu1 %v264_v2 }
  0x31   :  { %237 = vmatprep.subr.bf16.mxu0 %v265_v5  ;;  %250 = vmatprep.subr.bf16.mxu1 %v265_v5 }
  0x34   :  { %238 = vmatpush3.bf16.msra.mxu0 %v265_v5  ;;  %254 = vmatpush3.bf16.msra.mxu1 %v265_v5 }
  0x37   :  { %240 = vmatmul.mubr.msk.bf16.vlgmr.msra.gmra.mrb[0].mxu0 %vm108_vm0, %v268_v6  ;;  %244 = vmatmul.mubr.msk.bf16.vlgmr.msra.gmra.mrb[0].mxu1 %vm108_vm0, %v269_v7 }
 0x10a   :  { %v241_v9 = vpop.f32.mrb[0].mxu0  ;;  %v245_v10 = vpop.f32.mrb[0].mxu1 }
 0x10b   :  { %v164_v11 = vadd.f32 %v241_v9, %v210_v8  ;;  %v180_v12 = vadd.f32 %v245_v10, %v210_v8  ;;  %v155_v13 = vpop.f32.mrb[1].mxu0  ;;  %v171_v14 = vpop.f32.mrb[1].mxu1 }
 0x10c   :  { %v156_v15 = vadd.f32 %v210_v8, %v155_v13  ;;  %v172_v16 = vadd.f32 %v210_v8, %v171_v14  ;;  %v242_v17 = vpop.f32.mrb[2].mxu0  ;;  %v246_v18 = vpop.f32.mrb[2].mxu1 }
 0x10d   :  { %187 = vst [vmem:[#allocation7 + $0x10] sm:$0xff] %v164_v11  ;;  %191 = vst [vmem:[#allocation7 + $0x30] sm:$0xff] %v180_v12  ;;  %v167_v19 = vadd.f32 %v242_v17, %v210_v8  ;;  %v158_v20 = vpop.f32.mrb[3].mxu0  ;;  %v174_v21 = vpop.f32.mrb[3].mxu1 }
 0x10e   :  { %185 = vst [vmem:[#allocation7] sm:$0xff] %v156_v15  ;;  %189 = vst [vmem:[#allocation7 + $0x20] sm:$0xff] %v172_v16  ;;  %v159_v22 = vadd.f32 %v210_v8, %v158_v20  ;;  %v175_v23 = vadd.f32 %v210_v8, %v174_v21 }
 0x10f   :  { %188 = vst [vmem:[#allocation7 + $0x18] sm:$0xff] %v167_v19 }
 0x110   :  { %186 = vst [vmem:[#allocation7 + $0x8] sm:$0xff] %v159_v22  ;;  %190 = vst [vmem:[#allocation7 + $0x28] sm:$0xff] %v175_v23 }
 0x111   :  { %325 = shalt.err (!%p322_p6)
}
 0x112   :  { %s326_s15 = scalar_lea.hbm %s415_s3, 896 }
 0x113   :  { %p327_p7 = scmp.ne.s32.totalorder %s415_s3, %s326_s15  ;;  %p330_p8 = scmp.lt.u32.totalorder %s326_s15, %s415_s3 }
 0x115   :  { %p332_p9 = pnand %p330_p8, %p327_p7 }
 0x117   :  { %335 = shalt.err (!%p332_p9)
}
 0x118   :  { %s347_s20 = smov 128   ;;  %s348_s21 = smov 8  }
 0x119   :  { %203 = dma.vmem_to_hbm [thread:$0]  %s198_s12, 896, %s415_s3, [#allocation4], %s347_s20, %s347_s20, %s348_s21  }
 0x11a   :  { %340 = dma.done.wait [#allocation4], 896  }
 0x11b   :  { %341 = vsyncadd [#allocation4], 4294966400 }
 0x11c   :  { %207 = vsyncpa [#allocation3], 1 }
 0x11d   :  { %208 = vsyncpa [#allocation6], 1 }
 0x11e   :  { %209 = vsyncpa [#allocation4], 1 }

</bundles_post_ra>
